<compile_context>
chip_gen: v6e
topology: v6e:2x2x1
jax: 0.10.0
libtpu: 0.0.40
codegen_flags: <defaults>
</compile_context>

<pallas_src>
import functools

import numpy as np
import jax
import jax.numpy as jnp
from jax import lax
from jax.experimental import pallas as pl
from jax.experimental.pallas import tpu as pltpu


# --------------------------------------------------------------------------- kernel


def dcl_head_kernel(feat_ref, w_all_ref, cb_ref, pmask_ref, pmean_ref, cs_ref, mask_ref):
    """One grid step = nb batch images (channel-major, lane-concatenated).

    feat_ref : (1, C, L)          features, L = nb*HW (image b on lanes [b*HW, (b+1)*HW))
    w_all_ref: (O, C)             fused [Convmask | classifier | classifier_swap] weights
    cb_ref   : (1, 1) SMEM        Convmask bias
    pmask_ref: (L, Lo)            block-diagonal 2x2/stride-2 avg-pool matrix, Lo = nb*HWo
    pmean_ref: (nb, L)            per-image spatial-mean matrix (1/HW on image b's lanes)
    cs_ref   : (1, nb, 3*numcls)  classifier / classifier_swap rows
    mask_ref : (1, 1, Lo)         pooled + tanh'ed Convmask output, lane-dense
    """
    # One batched MXU matmul for all nb images: conv-mask row + class rows at once.
    t = jnp.dot(w_all_ref[...], feat_ref[0],
                preferred_element_type=jnp.float32)               # (O, L) f32

    # Convmask: 2x2/stride-2 average pool of the conv row for all images via the
    # block-diagonal pool matrix -> one lane-dense slab; the bias commutes with the
    # average (pool weights sum to 1), exactly matching conv(+bias) -> AvgPool2d -> tanh.
    pooled = jnp.dot(t[0:1, :].astype(pmask_ref.dtype), pmask_ref[...],
                     preferred_element_type=jnp.float32)          # (1, Lo)
    mask_ref[0] = jnp.tanh(pooled + cb_ref[0, 0])

    # classifier / classifier_swap: AdaptiveAvgPool2d(1) commutes with the bias-free
    # Linears, so take per-image spatial means of t's class rows; the A @ B^T
    # contraction over the lane axis yields (nb, 3*numcls) rows directly
    # (no transpose, one whole-tile store).
    cs_ref[0] = lax.dot_general(
        pmean_ref[...], t[1:, :].astype(pmean_ref.dtype),
        dimension_numbers=(((1,), (1,)), ((), ())),
        preferred_element_type=jnp.float32)                       # (nb, 3*numcls)


# --------------------------------------------------------------------------- helpers


def _round_up(x, m):
    return -(-x // m) * m


def _make_block_pool_matrix(H, W, nb):
    """(nb*HW, nb*HWo) block-diagonal matrix: 2x2/stride-2 average pool applied
    independently to each of the nb lane-concatenated images (entries 0 or 0.25)."""
    Ho, Wo = H // 2, W // 2
    HW, HWo = H * W, Ho * Wo
    s = np.arange(HW)
    i, j = s // W, s % W
    p = (i // 2) * Wo + (j // 2)
    pm = np.zeros((HW, HWo), np.float32)
    pm[s, p] = 0.25
    blk = np.zeros((nb * HW, nb * HWo), np.float32)
    for b in range(nb):
        blk[b * HW:(b + 1) * HW, b * HWo:(b + 1) * HWo] = pm
    return jnp.asarray(blk, jnp.bfloat16)          # 0 / 0.25: exact in bf16


def _make_block_mean_matrix(HW, nb):
    """(nb, nb*HW) matrix: row b holds 1/HW on image b's lanes (per-image spatial mean)."""
    m = np.zeros((nb, nb * HW), np.float32)
    for b in range(nb):
        m[b, b * HW:(b + 1) * HW] = 1.0 / HW
    return jnp.asarray(m, jnp.bfloat16)


def _vmem_capacity_bytes():
    """Best-effort VMEM capacity query; None if unavailable."""
    try:
        info = pltpu.get_tpu_info()
    except Exception:
        return None
    for name in ("vmem_capacity_bytes", "vmem_size_bytes", "vmem_bytes"):
        v = getattr(info, name, None)
        if v:
            try:
                return int(v)
            except (TypeError, ValueError):
                pass
    return None


def _estimate_vmem_bytes(nb, C, HW, HWo, O, feat_itemsize):
    """Padding-aware per-step VMEM estimate (lane pad to 128, bf16 sublane pad to 16),
    x2 for Pallas double buffering of every pipelined operand."""
    L, Lo = nb * HW, nb * HWo
    feat_b = C * _round_up(L, 128) * feat_itemsize
    pmask_b = _round_up(L, 16) * _round_up(Lo, 128) * 2
    pmean_b = _round_up(nb, 16) * _round_up(L, 128) * 2
    wall_b = _round_up(O, 16) * C * 2
    out_b = (_round_up(nb, 8) * 128 + 8 * _round_up(Lo, 128)) * 4
    return 2 * (feat_b + pmask_b + pmean_b + wall_b + out_b)


def _pick_batch_block(N, C, HW, HWo, O, feat_itemsize, *, small_vmem, vmem_limit,
                      max_nb=16):
    """Largest divisor of N (<= max_nb) whose padded, double-buffered footprint fits;
    on small-VMEM (v7x-like, 2 TC) parts prefer >= 2 grid steps per core."""
    budget = int(0.7 * vmem_limit)
    cands = [d for d in range(1, min(N, max_nb) + 1)
             if N % d == 0
             and _estimate_vmem_bytes(d, C, HW, HWo, O, feat_itemsize) <= budget]
    if not cands:
        return 1
    if small_vmem:
        for pred in (lambda d: N // d >= 4 and (N // d) % 2 == 0,
                     lambda d: N // d >= 2,
                     lambda d: True):
            ok = [d for d in cands if pred(d)]
            if ok:
                return max(ok)
    # v5e / v6e: single TensorCore per chip, big VMEM -- just maximize the block.
    return max(cands)


# --------------------------------------------------------------------------- wrapper


@functools.partial(jax.jit, static_argnames=("numcls",))
def dcl_forward(feat_nchw, w_cls, w_swap, conv_w, conv_b, *, numcls):
    """Forward of MainModel's DCL head (use_dcl=True, use_Asoftmax=False).

    feat_nchw: (N, 2560, H, W) backbone output (bf16 recommended).
    w_cls    : (numcls, 2560)   torch Linear layout
    w_swap   : (2*numcls, 2560) torch Linear layout
    conv_w   : (1, 2560, 1, 1)  torch Conv2d layout
    conv_b   : (1,)
    Returns (cls, cls_swap, mask_flat).
    """
    N, C, H, W = feat_nchw.shape
    assert H % 2 == 0 and W % 2 == 0
    HW, Ho, Wo = H * W, H // 2, W // 2
    HWo = Ho * Wo
    O = 1 + 3 * numcls
    cdtype = feat_nchw.dtype

    vmem_cap = _vmem_capacity_bytes()
    small_vmem = vmem_cap is None or vmem_cap < (100 << 20)   # v7x: 64 MiB physical
    vmem_limit = (32 << 20) if small_vmem else (64 << 20)

    nb = _pick_batch_block(N, C, HW, HWo, O, feat_nchw.dtype.itemsize,
                           small_vmem=small_vmem, vmem_limit=vmem_limit)
    G = N // nb
    L, Lo = nb * HW, nb * HWo

    # Channel-major block layout: the nb images of one grid step concatenated on the
    # lane axis -> (G, C, nb*HW).  (See TODO(synk) above about fusing this relayout.)
    feat_cm = (feat_nchw.reshape(G, nb, C, HW)
               .transpose(0, 2, 1, 3)
               .reshape(G, C, L))

    # Fuse the three weight matrices into one (O, C) operand (tiny, cast to feat dtype).
    w_all = jnp.concatenate(
        [conv_w.reshape(1, C),
         w_cls.reshape(numcls, C),
         w_swap.reshape(2 * numcls, C)], axis=0).astype(cdtype)
    bias = jnp.asarray(conv_b, jnp.float32).reshape(1, 1)
    pmask = _make_block_pool_matrix(H, W, nb)        # (L, Lo) bf16, block-diagonal
    pmean = _make_block_mean_matrix(HW, nb)          # (nb, L) bf16

    cs3, mask3 = pl.pallas_call(
        dcl_head_kernel,
        grid=(G,),
        in_specs=[
            pl.BlockSpec((1, C, L), lambda n: (n, 0, 0)),
            pl.BlockSpec((O, C), lambda n: (0, 0)),
            pl.BlockSpec(memory_space=pltpu.MemorySpace.SMEM),
            pl.BlockSpec((L, Lo), lambda n: (0, 0)),
            pl.BlockSpec((nb, L), lambda n: (0, 0)),
        ],
        out_specs=[
            pl.BlockSpec((1, nb, 3 * numcls), lambda n: (n, 0, 0)),
            pl.BlockSpec((1, 1, Lo), lambda n: (n, 0, 0)),
        ],
        out_shape=(
            jax.ShapeDtypeStruct((G, nb, 3 * numcls), jnp.float32),
            jax.ShapeDtypeStruct((G, 1, Lo), jnp.float32),
        ),
        compiler_params=pltpu.CompilerParams(
            dimension_semantics=("parallel",),
            vmem_limit_bytes=vmem_limit),
    )(feat_cm, w_all, bias, pmask, pmean)

    cs = cs3.reshape(N, 3 * numcls)       # contiguous, no transpose needed
    mask = mask3.reshape(N, HWo)          # contiguous, no transpose needed
    return cs[:, :numcls], cs[:, numcls:], mask


# --------------------------------------------------------------------------- main


if __name__ == "__main__":
    # Small shapes consistent with the module: channel dim must be 2560 for the
    # Linear(2560, ...) layers; keep batch / spatial small.
    N, C, H, W = 2, 2560, 8, 8
    numcls = 4
    HW, Ho, Wo = H * W, H // 2, W // 2

    key = jax.random.PRNGKey(0)
    kx, kc, ks, kw, kb = jax.random.split(key, 5)

    # Backbone feature map (stands in for self.model(x) output), NCHW, emitted in bf16
    # so the kernel's dominant HBM read is half-width.
    feat_nchw = jax.random.normal(kx, (N, C, H, W), dtype=jnp.float32).astype(jnp.bfloat16)

    # Torch-layout parameters (Linear weight (out, in); Conv2d weight (1, 2560, 1, 1)).
    scale = 1.0 / jnp.sqrt(jnp.float32(C))
    w_cls = jax.random.normal(kc, (numcls, C), jnp.float32) * scale
    w_swap = jax.random.normal(ks, (2 * numcls, C), jnp.float32) * scale
    conv_w = jax.random.normal(kw, (1, C, 1, 1), jnp.float32) * scale
    conv_b = jax.random.normal(kb, (1,), jnp.float32) * scale

    out_cls, out_swap, out_mask = jax.block_until_ready(
        dcl_forward(feat_nchw, w_cls, w_swap, conv_w, conv_b, numcls=numcls))

    # Pure-JAX fp32 reference of the torch forward on the same bf16-rounded operands.
    xf = feat_nchw.astype(jnp.float32)
    wc = w_cls.astype(jnp.bfloat16).astype(jnp.float32)
    wsw = w_swap.astype(jnp.bfloat16).astype(jnp.float32)
    cw = conv_w.reshape(C).astype(jnp.bfloat16).astype(jnp.float32)
    pooled = xf.mean(axis=(2, 3))                                # AdaptiveAvgPool2d(1)
    ref_cls = pooled @ wc.T                                      # classifier
    ref_swap = pooled @ wsw.T                                    # classifier_swap
    m = jnp.einsum('nchw,c->nhw', xf, cw) + conv_b[0]            # Convmask (1x1 conv + bias)
    m = m.reshape(N, Ho, 2, Wo, 2).mean(axis=(2, 4))             # AvgPool2d(2, 2)
    ref_mask = jnp.tanh(m).reshape(N, Ho * Wo)                   # tanh + flatten

    assert out_cls.shape == (N, numcls)
    assert out_swap.shape == (N, 2 * numcls)
    assert out_mask.shape == (N, Ho * Wo)
    assert jnp.allclose(out_cls, ref_cls, rtol=5e-2, atol=5e-2)
    assert jnp.allclose(out_swap, ref_swap, rtol=5e-2, atol=5e-2)
    assert jnp.allclose(out_mask, ref_mask, rtol=5e-2, atol=5e-2)

    print("KERNEL_OK")
</pallas_src>

<mosaic_0001>
module attributes {stable_mosaic.version = 11 : i64} {
  func.func @dcl_head_kernel(%arg0: i32, %arg1: memref<1x2560x64xbf16, #tpu.memory_space<vmem>>, %arg2: memref<13x2560xbf16, #tpu.memory_space<vmem>>, %arg3: memref<1x1xf32, #tpu.memory_space<smem>>, %arg4: memref<64x16xbf16, #tpu.memory_space<vmem>>, %arg5: memref<1x64xbf16, #tpu.memory_space<vmem>>, %arg6: memref<1x1x12xf32, #tpu.memory_space<vmem>>, %arg7: memref<1x1x16xf32, #tpu.memory_space<vmem>>) attributes {dimension_semantics = [#tpu.dimension_semantics<parallel>], iteration_bounds = array<i64: 2>, scalar_prefetch = 0 : i64, scratch_operands = 0 : i64, tpu.core_type = #tpu.core_type<tc>, window_params = [{transform_indices = @transform_0, window_bounds = array<i64: 1, 2560, 64>}, {pipeline_mode = #tpu.pipeline_mode<synchronous>, transform_indices = @transform_1, window_bounds = array<i64: 13, 2560>}, {transform_indices = @transform_2, window_bounds = array<i64: 1, 1>}, {pipeline_mode = #tpu.pipeline_mode<synchronous>, transform_indices = @transform_3, window_bounds = array<i64: 64, 16>}, {pipeline_mode = #tpu.pipeline_mode<synchronous>, transform_indices = @transform_4, window_bounds = array<i64: 1, 64>}, {transform_indices = @transform_5, window_bounds = array<i64: 1, 1, 12>}, {transform_indices = @transform_6, window_bounds = array<i64: 1, 1, 16>}]} {
    %c0 = arith.constant 0 : index
    %c0_0 = arith.constant 0 : index
    %0 = vector.load %arg2[%c0, %c0_0] : memref<13x2560xbf16, #tpu.memory_space<vmem>>, vector<13x2560xbf16>
    %c0_1 = arith.constant 0 : index
    %c0_2 = arith.constant 0 : index
    %c0_3 = arith.constant 0 : index
    %1 = vector.load %arg1[%c0_1, %c0_2, %c0_3] : memref<1x2560x64xbf16, #tpu.memory_space<vmem>>, vector<1x2560x64xbf16>
    %2 = vector.shape_cast %1 : vector<1x2560x64xbf16> to vector<2560x64xbf16>
    %cst = arith.constant dense<0.000000e+00> : vector<13x64xf32>
    %3 = tpu.matmul %0, %2, %cst {dimension_numbers = #tpu.dot_dimension_numbers<[1], [0], [0], [1], [0, 0, 1, 1], [], []>} : vector<13x2560xbf16>, vector<2560x64xbf16>, vector<13x64xf32> -> vector<13x64xf32>
    %4 = vector.extract_strided_slice %3 {offsets = [0, 0], sizes = [1, 64], strides = [1, 1]} : vector<13x64xf32> to vector<1x64xf32>
    %5 = arith.truncf %4 : vector<1x64xf32> to vector<1x64xbf16>
    %c0_4 = arith.constant 0 : index
    %c0_5 = arith.constant 0 : index
    %6 = vector.load %arg4[%c0_4, %c0_5] : memref<64x16xbf16, #tpu.memory_space<vmem>>, vector<64x16xbf16>
    %cst_6 = arith.constant dense<0.000000e+00> : vector<1x16xf32>
    %7 = tpu.matmul %5, %6, %cst_6 {dimension_numbers = #tpu.dot_dimension_numbers<[1], [0], [0], [1], [0, 0, 1, 1], [], []>} : vector<1x64xbf16>, vector<64x16xbf16>, vector<1x16xf32> -> vector<1x16xf32>
    %c0_7 = arith.constant 0 : index
    %c0_8 = arith.constant 0 : index
    %8 = memref.load %arg3[%c0_7, %c0_8] : memref<1x1xf32, #tpu.memory_space<smem>>
    %9 = vector.broadcast %8 : f32 to vector<1x16xf32>
    %10 = arith.addf %7, %9 : vector<1x16xf32>
    %11 = math.tanh %10 : vector<1x16xf32>
    %c0_9 = arith.constant 0 : index
    %c0_10 = arith.constant 0 : index
    %c0_11 = arith.constant 0 : index
    %12 = vector.load %arg7[%c0_9, %c0_10, %c0_11] : memref<1x1x16xf32, #tpu.memory_space<vmem>>, vector<1x1x16xf32>
    %13 = vector.shape_cast %12 : vector<1x1x16xf32> to vector<1x16xf32>
    %14 = vector.shape_cast %11 : vector<1x16xf32> to vector<1x1x16xf32>
    tpu.vector_store %arg7[%c0_9, %c0_10, %c0_11], %14 {strides = array<i32>} : memref<1x1x16xf32, #tpu.memory_space<vmem>>, vector<1x1x16xf32>,
    %c0_12 = arith.constant 0 : index
    %c0_13 = arith.constant 0 : index
    %15 = vector.load %arg5[%c0_12, %c0_13] : memref<1x64xbf16, #tpu.memory_space<vmem>>, vector<1x64xbf16>
    %16 = vector.extract_strided_slice %3 {offsets = [1, 0], sizes = [12, 64], strides = [1, 1]} : vector<13x64xf32> to vector<12x64xf32>
    %17 = arith.truncf %16 : vector<12x64xf32> to vector<12x64xbf16>
    %cst_14 = arith.constant dense<0.000000e+00> : vector<1x12xf32>
    %18 = tpu.matmul %15, %17, %cst_14 {dimension_numbers = #tpu.dot_dimension_numbers<[1], [1], [0], [0], [0, 0, 1, 0], [], []>} : vector<1x64xbf16>, vector<12x64xbf16>, vector<1x12xf32> -> vector<1x12xf32>
    %c0_15 = arith.constant 0 : index
    %c0_16 = arith.constant 0 : index
    %c0_17 = arith.constant 0 : index
    %19 = vector.load %arg6[%c0_15, %c0_16, %c0_17] : memref<1x1x12xf32, #tpu.memory_space<vmem>>, vector<1x1x12xf32>
    %20 = vector.shape_cast %19 : vector<1x1x12xf32> to vector<1x12xf32>
    %21 = vector.shape_cast %18 : vector<1x12xf32> to vector<1x1x12xf32>
    tpu.vector_store %arg6[%c0_15, %c0_16, %c0_17], %21 {strides = array<i32>} : memref<1x1x12xf32, #tpu.memory_space<vmem>>, vector<1x1x12xf32>,
    return
  }
  func.func @transform_0(%arg0: i32) -> (i32, i32, i32) {
    %c0_i32 = arith.constant 0 : i32
    %c0_i32_0 = arith.constant 0 : i32
    %c0_i32_1 = arith.constant 0 : i32
    return %arg0, %c0_i32, %c0_i32_0 : i32, i32, i32
  }
  func.func @transform_1(%arg0: i32) -> (i32, i32) {
    %c0_i32 = arith.constant 0 : i32
    %c0_i32_0 = arith.constant 0 : i32
    %c0_i32_1 = arith.constant 0 : i32
    return %c0_i32, %c0_i32_0 : i32, i32
  }
  func.func @transform_2(%arg0: i32) -> (i32, i32) {
    %c0_i32 = arith.constant 0 : i32
    %c0_i32_0 = arith.constant 0 : i32
    %c0_i32_1 = arith.constant 0 : i32
    return %c0_i32, %c0_i32_0 : i32, i32
  }
  func.func @transform_3(%arg0: i32) -> (i32, i32) {
    %c0_i32 = arith.constant 0 : i32
    %c0_i32_0 = arith.constant 0 : i32
    %c0_i32_1 = arith.constant 0 : i32
    return %c0_i32, %c0_i32_0 : i32, i32
  }
  func.func @transform_4(%arg0: i32) -> (i32, i32) {
    %c0_i32 = arith.constant 0 : i32
    %c0_i32_0 = arith.constant 0 : i32
    %c0_i32_1 = arith.constant 0 : i32
    return %c0_i32, %c0_i32_0 : i32, i32
  }
  func.func @transform_5(%arg0: i32) -> (i32, i32, i32) {
    %c0_i32 = arith.constant 0 : i32
    %c0_i32_0 = arith.constant 0 : i32
    %c0_i32_1 = arith.constant 0 : i32
    return %arg0, %c0_i32, %c0_i32_0 : i32, i32, i32
  }
  func.func @transform_6(%arg0: i32) -> (i32, i32, i32) {
    %c0_i32 = arith.constant 0 : i32
    %c0_i32_0 = arith.constant 0 : i32
    %c0_i32_1 = arith.constant 0 : i32
    return %arg0, %c0_i32, %c0_i32_0 : i32, i32, i32
  }
}

</mosaic_0001>

<bundles_post_ra>
// kernel: dcl_forward.1
= control target key start
LH: loop header
LB: loop body
LE: loop exit
PB: predicated region body
PF: predicated region fallthrough
CT: control target
= control target key end

     0   :  { %s3431_s0 = inlined_call_operand.vmem [shape: bf16[2,2560,64], index: 0, kind: input, shape index: {}]   ;;  %s3432_s1 = inlined_call_operand.vmem [shape: bf16[13,2560], index: 1, kind: input, shape index: {}]   ;;  %s3433_s2 = inlined_call_operand.<no memory space> [shape: f32[1,1], index: 2, kind: input, shape index: {}]   ;;  %s3434_s3 = inlined_call_operand.vmem [shape: bf16[64,16], index: 3, kind: input, shape index: {}]   ;;  %s3435_s4 = inlined_call_operand.vmem [shape: bf16[1,64], index: 4, kind: input, shape index: {}]   ;;  %s3436_s5 = inlined_call_operand.vmem [shape: f32[2,1,12], index: 5, kind: output, shape index: {0}]   ;;  %s3437_s6 = inlined_call_operand.hbm [shape: f32[2,1,16], index: 6, kind: output, shape index: {1}]  }
   0x1   :  { %12 = sst [smem:[#allocation2]] %s3433_s2 }
   0x2   :  { %13 = vsyncpa [#allocation4], 0 }
   0x3   :  { %15 = vsyncpa [#allocation4 + $0x1], 0  ;;  %s3082_s23 = smov 0   ;;  %s3084_s24 = smov 0  }
   0x4   :  { %s3086_s25 = smov 0   ;;  %s3088_s26 = smov 0  }
   0x5 LB: > { %s3103_s2 = sadd.s32 4294967295, %s3039_s26   ;;  %s2302_s27 = sadd.s32 4294967294, %s3039_s26   ;;  %s3039_s26 = sphi %s3088_s26, %s3443_s26   ;;  %s3035_s25 = sphi %s3086_s25, %s3442_s25   ;;  %s3031_s24 = sphi %s3084_s24, %s3441_s24   ;;  %s3027_s23 = sphi %s3082_s23, %s3440_s23  }
   0x6   : > { %s3107_s28 = sadd.s32 1, %s3039_s26   ;;  %s164_s29 = sadd.s32 1, %s3035_s25 }
   0x7   : > { %s161_s30 = ssub.s32 %s3039_s26, %s3107_s28  ;;  %p174_p0 = scmp.ne.s32.totalorder %s3035_s25, %s3031_s24 }
   0x8   : > { %p162_p1 = scmp.eq.s32.totalorder %s161_s30, 0  ;;  %p175_p2 = scmp.eq.s32.totalorder %s3103_s2, 1 }
   0x9   : > { %p180_p3 = scmp.ne.s32.totalorder %s3031_s24, %s3027_s23  ;;  %p181_p4 = scmp.eq.s32.totalorder %s2302_s27, 1 }
   0xa   : > { %s3118_s7 = scalar_select %p162_p1, %s3035_s25, %s164_s29  }
   0xb   : > { %p3120_p5 = por %p175_p2, %p174_p0  ;;  %p3124_p6 = por %p181_p4, %p180_p3 }
   0xc   : > { %p2305_p7 = scmp.ge.s32.totalorder %s3039_s26, 1  ;;  %p219_p8 = scmp.lt.s32.totalorder %s3039_s26, 3 }
   0xe   : > { %p220_p9 = pnand %p2305_p7, %p219_p8 }
   0xf   : > { %p251_p10 = scmp.lt.s32.totalorder (!%p220_p9), %s3103_s2, 1  ;;  %s2079_s22 = sld [smem:[#allocation2]] (!%p220_p9) }
  0x10   : > { %223 = sbr.rel (%p220_p9) target bundleno = 618 (0x26a), region = 40  ;;  %s249_s27 = sand.u32 (!%p220_p9), 1, %s3031_s24  }
  0x11   : > { %s2493_s29 = sshll.u32 (!%p220_p9), %s3103_s2, 4  ;;  %s250_s30 = scalar_lea.vmem (!%p220_p9), [#allocation3], %s249_s27 }
  0x12   : > { %s2228_s10 = sshll.u32 (!%p220_p9), %s250_s30, 4  ;;  %s3380_s13 = scalar_lea.hbm (!%p220_p9), %s3437_s6, %s2493_s29  ;;  %s3382_s10 = int_to_ptr.vmem [resolvable:$true] %s2228_s10 }
  0x13   : > { %s2979_s17 = scalar_lea.vmem (!%p220_p9), %s3382_s10, 16  ;;  %s3043_s19 = smov (!%p220_p9), [#allocation3]  }
  0x14   : > { %p2980_p11 = scmp.ne.s32.totalorder (!%p220_p9), %s3382_s10, %s2979_s17  ;;  %s2983_s20 = sshll.u32 (!%p220_p9), %s3043_s19, 4  ;;  %s2984_s20 = int_to_ptr.vmem [resolvable:$false] %s2983_s20 }
  0x15   : > { %v2817_v0 = vld [vmem:[%s3432_s1 + $0x4] ss:$80 sps:$4 sm:$0x7f]   ;;  %s3135_s12 = scalar_select %p251_p10, %s3103_s2, 1  ;;  %vm3042_vm0 = vmmov 0   ;;  %vm2105_vm1 = vcmask 523264  }
  0x16   : > { %1692 = vmatprep.mubr.bf16.mxu0 %v2817_v0  ;;  %v2820_v1 = vld [vmem:[%s3432_s1 + $0xc] ss:$80 sps:$4 sm:$0x7f]   ;;  %v2815_v32 = vld [vmem:[%s3432_s1] ss:$80 sps:$4 sm:$0x7f]   ;;  %p2981_p12 = pnand %p2980_p11, %p3120_p5  ;;  %p2986_p0 = scmp.lt.s32.totalorder %s3382_s10, %s2984_s20 }
  0x17   : > { %s2741_s15 = smul.u32 1280, %s3135_s12  ;;  %1733 = vmatprep.mubr.bf16.mxu1 %v2820_v1  ;;  %v2818_v34 = vld [vmem:[%s3432_s1 + $0x8] ss:$80 sps:$4 sm:$0x7f]   ;;  %vm2150_vm2 = vcmask 122880   ;;  %s258_s16 = scalar_lea.vmem %s3436_s5, %s3135_s12  ;;  %vm2207_vm3 = vcmask 90112  }
  0x18   : > { %v2855_v36 = vld [vmem:[%s3432_s1 + $0x14] ss:$80 sps:$4 sm:$0x7f]   ;;  %v2858_v38 = vld [vmem:[%s3432_s1 + $0x1c] ss:$80 sps:$4 sm:$0x7f]   ;;  %p2982_p13 = pneg %p2981_p12 }
  0x19   : > { %s3144_s18 = scalar_lea.vmem %s3431_s0, %s2741_s15  ;;  %s2213_s2 = scalar_lea.sflag [#allocation4], %s249_s27 }
  0x1a   : > { %v2783_v2 = vld [vmem:[%s3144_s18 + $0x78] sm:$0xff]   ;;  %v2787_v6 = vld [vmem:[%s3144_s18 + $0x70] sm:$0xff]   ;;  %v2791_v10 = vld [vmem:[%s3144_s18 + $0x68] sm:$0xff]   ;;  %s2985_s21 = scalar_lea.vmem %s2984_s20, 32 }
  0x1b   : > { %v2784_v3 = vld [vmem:[%s3144_s18 + $0xf8] sm:$0xff]   ;;  %2496 = vmatprep.subr.bf16.mxu0 %v2783_v2  ;;  %v2788_v7 = vld [vmem:[%s3144_s18 + $0xf0] sm:$0xff]   ;;  %v2792_v11 = vld [vmem:[%s3144_s18 + $0xe8] sm:$0xff]   ;;  %p2987_p1 = scmp.lt.s32.totalorder %s2985_s21, %s2979_s17 }
  0x1c   : > { %v2785_v4 = vld [vmem:[%s3144_s18 + $0x38] sm:$0xff]   ;;  %2518 = vmatprep.subr.bf16.mxu1 %v2784_v3  ;;  %v2789_v8 = vld [vmem:[%s3144_s18 + $0x30] sm:$0xff]   ;;  %v2793_v12 = vld [vmem:[%s3144_s18 + $0x28] sm:$0xff]  }
  0x1d   : > { %v2786_v5 = vld [vmem:[%s3144_s18 + $0xb8] sm:$0xff]   ;;  %2497 = vmatpush3.bf16.msra.mxu0 %v2785_v4  ;;  %v2790_v9 = vld [vmem:[%s3144_s18 + $0xb0] sm:$0xff]   ;;  %v2794_v13 = vld [vmem:[%s3144_s18 + $0xa8] sm:$0xff]   ;;  %p2988_p2 = por %p2987_p1, %p2986_p0 }
  0x1e   : > { %2519 = vmatpush3.bf16.msra.mxu1 %v2786_v5  ;;  %2498 = vmatprep.subr.bf16.mxu0 %v2787_v6  ;;  %v2795_v14 = vld [vmem:[%s3144_s18 + $0x60] sm:$0xff]   ;;  %v2799_v18 = vld [vmem:[%s3144_s18 + $0x58] sm:$0xff]   ;;  %v2803_v22 = vld [vmem:[%s3144_s18 + $0x50] sm:$0xff]  }
  0x1f   : > { %2520 = vmatprep.subr.bf16.mxu1 %v2788_v7  ;;  %v2796_v15 = vld [vmem:[%s3144_s18 + $0xe0] sm:$0xff]   ;;  %v2800_v19 = vld [vmem:[%s3144_s18 + $0xd8] sm:$0xff]   ;;  %v2804_v23 = vld [vmem:[%s3144_s18 + $0xd0] sm:$0xff]   ;;  %p2989_p3 = pnand %p2988_p2, %p2982_p13 }
  0x20   : > { %v2797_v16 = vld [vmem:[%s3144_s18 + $0x20] sm:$0xff]   ;;  %v2801_v20 = vld [vmem:[%s3144_s18 + $0x18] sm:$0xff]   ;;  %v2805_v24 = vld [vmem:[%s3144_s18 + $0x10] sm:$0xff]  }
  0x21   : > { %2499 = vmatpush3.bf16.msra.mxu0 %v2789_v8  ;;  %v2798_v17 = vld [vmem:[%s3144_s18 + $0xa0] sm:$0xff]   ;;  %v2802_v21 = vld [vmem:[%s3144_s18 + $0x98] sm:$0xff]   ;;  %v2806_v25 = vld [vmem:[%s3144_s18 + $0x90] sm:$0xff]  }
  0x22   : > { %2521 = vmatpush3.bf16.msra.mxu1 %v2790_v9  ;;  %2500 = vmatprep.subr.bf16.mxu0 %v2791_v10  ;;  %v2807_v26 = vld [vmem:[%s3144_s18 + $0x48] sm:$0xff]   ;;  %v2811_v30 = vld [vmem:[%s3144_s18 + $0x40] sm:$0xff]   ;;  %v2821_v37 = vld [vmem:[%s3144_s18 + $0x178] sm:$0xff]  }
  0x23   : > { %2522 = vmatprep.subr.bf16.mxu1 %v2792_v11  ;;  %v2808_v27 = vld [vmem:[%s3144_s18 + $0xc8] sm:$0xff]   ;;  %v2812_v31 = vld [vmem:[%s3144_s18 + $0xc0] sm:$0xff]   ;;  %v2822_v39 = vld [vmem:[%s3144_s18 + $0x1f8] sm:$0xff]  }
  0x24   : > { %v2809_v28 = vld [vmem:[%s3144_s18 + $0x8] sm:$0xff]   ;;  %v2813_v33 = vld [vmem:[%s3144_s18] sm:$0xff]   ;;  %v2823_v40 = vld [vmem:[%s3144_s18 + $0x138] sm:$0xff]  }
  0x25   : > { %2501 = vmatpush3.bf16.msra.mxu0 %v2793_v12  ;;  %v2810_v29 = vld [vmem:[%s3144_s18 + $0x88] sm:$0xff]   ;;  %v2814_v35 = vld [vmem:[%s3144_s18 + $0x80] sm:$0xff]   ;;  %v2824_v41 = vld [vmem:[%s3144_s18 + $0x1b8] sm:$0xff]  }
  0x26   : > { %2523 = vmatpush3.bf16.msra.mxu1 %v2794_v13  ;;  %2502 = vmatprep.subr.bf16.mxu0 %v2795_v14  ;;  %v2825_v42 = vld [vmem:[%s3144_s18 + $0x170] sm:$0xff]   ;;  %v2829_v46 = vld [vmem:[%s3144_s18 + $0x168] sm:$0xff]   ;;  %v2833_v50 = vld [vmem:[%s3144_s18 + $0x160] sm:$0xff]  }
  0x27   : > { %2524 = vmatprep.subr.bf16.mxu1 %v2796_v15  ;;  %v2826_v43 = vld [vmem:[%s3144_s18 + $0x1f0] sm:$0xff]   ;;  %v2830_v47 = vld [vmem:[%s3144_s18 + $0x1e8] sm:$0xff]   ;;  %v2834_v51 = vld [vmem:[%s3144_s18 + $0x1e0] sm:$0xff]  }
  0x28   : > { %v2827_v44 = vld [vmem:[%s3144_s18 + $0x130] sm:$0xff]   ;;  %v2831_v48 = vld [vmem:[%s3144_s18 + $0x128] sm:$0xff]   ;;  %v2835_v52 = vld [vmem:[%s3144_s18 + $0x120] sm:$0xff]  }
  0x29   : > { %2503 = vmatpush3.bf16.msra.mxu0 %v2797_v16  ;;  %v2828_v45 = vld [vmem:[%s3144_s18 + $0x1b0] sm:$0xff]   ;;  %v2832_v49 = vld [vmem:[%s3144_s18 + $0x1a8] sm:$0xff]   ;;  %v2836_v53 = vld [vmem:[%s3144_s18 + $0x1a0] sm:$0xff]  }
  0x2a   : > { %2525 = vmatpush3.bf16.msra.mxu1 %v2798_v17  ;;  %2504 = vmatprep.subr.bf16.mxu0 %v2799_v18  ;;  %v2837_v54 = vld [vmem:[%s3144_s18 + $0x158] sm:$0xff]   ;;  %v2841_v58 = vld [vmem:[%s3144_s18 + $0x150] sm:$0xff]   ;;  %v2845_v62 = vld [vmem:[%s3144_s18 + $0x148] sm:$0xff]  }
  0x2b   : > { %2526 = vmatprep.subr.bf16.mxu1 %v2800_v19  ;;  %v2838_v55 = vld [vmem:[%s3144_s18 + $0x1d8] sm:$0xff]   ;;  %v2842_v59 = vld [vmem:[%s3144_s18 + $0x1d0] sm:$0xff]   ;;  %v2846_v63 = vld [vmem:[%s3144_s18 + $0x1c8] sm:$0xff]  }
  0x2c   : > { %v2839_v56 = vld [vmem:[%s3144_s18 + $0x118] sm:$0xff]   ;;  %v2843_v60 = vld [vmem:[%s3144_s18 + $0x110] sm:$0xff]   ;;  %v2847_v0 = vld [vmem:[%s3144_s18 + $0x108] sm:$0xff]  }
  0x2d   : > { %2505 = vmatpush3.bf16.msra.mxu0 %v2801_v20  ;;  %v2840_v57 = vld [vmem:[%s3144_s18 + $0x198] sm:$0xff]   ;;  %v2844_v61 = vld [vmem:[%s3144_s18 + $0x190] sm:$0xff]   ;;  %v2848_v1 = vld [vmem:[%s3144_s18 + $0x188] sm:$0xff]  }
  0x2e   : > { %2527 = vmatpush3.bf16.msra.mxu1 %v2802_v21  ;;  %2506 = vmatprep.subr.bf16.mxu0 %v2803_v22  ;;  %v2849_v2 = vld [vmem:[%s3144_s18 + $0x140] sm:$0xff]   ;;  %v2856_v6 = vld [vmem:[%s3432_s1 + $0x18] ss:$80 sps:$4 sm:$0x7f]   ;;  %v2863_v12 = vld [vmem:[%s3144_s18 + $0x270] sm:$0xff]  }
  0x2f   : > { %2528 = vmatprep.subr.bf16.mxu1 %v2804_v23  ;;  %v2850_v3 = vld [vmem:[%s3144_s18 + $0x1c0] sm:$0xff]   ;;  %v2859_v8 = vld [vmem:[%s3144_s18 + $0x278] sm:$0xff]   ;;  %v2864_v13 = vld [vmem:[%s3144_s18 + $0x2f0] sm:$0xff]  }
  0x30   : > { %v2853_v4 = vld [vmem:[%s3432_s1 + $0x10] ss:$80 sps:$4 sm:$0x7f]   ;;  %v2860_v9 = vld [vmem:[%s3144_s18 + $0x2f8] sm:$0xff]   ;;  %v2867_v16 = vld [vmem:[%s3144_s18 + $0x268] sm:$0xff]  }
  0x31   : > { %2507 = vmatpush3.bf16.msra.mxu0 %v2805_v24  ;;  %v2851_v5 = vld [vmem:[%s3144_s18 + $0x100] sm:$0xff]   ;;  %v2861_v10 = vld [vmem:[%s3144_s18 + $0x238] sm:$0xff]   ;;  %v2865_v14 = vld [vmem:[%s3144_s18 + $0x230] sm:$0xff]  }
  0x32   : > { %2529 = vmatpush3.bf16.msra.mxu1 %v2806_v25  ;;  %2508 = vmatprep.subr.bf16.mxu0 %v2807_v26  ;;  %v2852_v7 = vld [vmem:[%s3144_s18 + $0x180] sm:$0xff]   ;;  %v2862_v11 = vld [vmem:[%s3144_s18 + $0x2b8] sm:$0xff]   ;;  %v2866_v15 = vld [vmem:[%s3144_s18 + $0x2b0] sm:$0xff]  }
  0x33   : > { %2530 = vmatprep.subr.bf16.mxu1 %v2808_v27  ;;  %v2868_v17 = vld [vmem:[%s3144_s18 + $0x2e8] sm:$0xff]   ;;  %v2871_v20 = vld [vmem:[%s3144_s18 + $0x260] sm:$0xff]   ;;  %v2875_v24 = vld [vmem:[%s3144_s18 + $0x258] sm:$0xff]  }
  0x34   : > { %v2869_v18 = vld [vmem:[%s3144_s18 + $0x228] sm:$0xff]   ;;  %v2872_v21 = vld [vmem:[%s3144_s18 + $0x2e0] sm:$0xff]   ;;  %v2876_v25 = vld [vmem:[%s3144_s18 + $0x2d8] sm:$0xff]  }
  0x35   : > { %2509 = vmatpush3.bf16.msra.mxu0 %v2809_v28  ;;  %v2870_v19 = vld [vmem:[%s3144_s18 + $0x2a8] sm:$0xff]   ;;  %v2873_v22 = vld [vmem:[%s3144_s18 + $0x220] sm:$0xff]   ;;  %v2877_v26 = vld [vmem:[%s3144_s18 + $0x218] sm:$0xff]  }
  0x36   : > { %2531 = vmatpush3.bf16.msra.mxu1 %v2810_v29  ;;  %2510 = vmatprep.subr.bf16.mxu0 %v2811_v30  ;;  %v2874_v23 = vld [vmem:[%s3144_s18 + $0x2a0] sm:$0xff]   ;;  %v2878_v27 = vld [vmem:[%s3144_s18 + $0x298] sm:$0xff]   ;;  %v2879_v28 = vld [vmem:[%s3144_s18 + $0x250] sm:$0xff]  }
  0x37   : > { %2532 = vmatprep.subr.bf16.mxu1 %v2812_v31  ;;  %v2880_v29 = vld [vmem:[%s3144_s18 + $0x2d0] sm:$0xff]  }
  0x38   : > { %v2881_v30 = vld [vmem:[%s3144_s18 + $0x210] sm:$0xff]  }
  0x39   : > { %2511 = vmatpush3.bf16.msra.mxu0 %v2813_v33  ;;  %v2882_v31 = vld [vmem:[%s3144_s18 + $0x290] sm:$0xff]   ;;  %v2884_v33 = vld [vmem:[%s3144_s18 + $0x2c8] sm:$0xff]  }
  0x3a   : > { %2533 = vmatpush3.bf16.msra.mxu1 %v2814_v35  ;;  %2540 = vmatprep.subr.bf16.mxu0 %v2821_v37  ;;  %v2886_v35 = vld [vmem:[%s3144_s18 + $0x288] sm:$0xff]   ;;  %v2888_v37 = vld [vmem:[%s3144_s18 + $0x2c0] sm:$0xff]  }
  0x3b   : > { %2562 = vmatprep.subr.bf16.mxu1 %v2822_v39  ;;  %v2890_v39 = vld [vmem:[%s3144_s18 + $0x280] sm:$0xff]  }
  0x3c   : > { %1693 = vmatmul.mubr.bf16.vlgmr.msra.gmra.mxu0 %v2815_v32  ;;  %v2883_v32 = vld [vmem:[%s3144_s18 + $0x248] sm:$0xff]  }
  0x3d   : > { %1734 = vmatmul.mubr.bf16.vlgmr.msra.gmra.mxu1 %v2818_v34  ;;  %2541 = vmatpush3.bf16.msra.mxu0 %v2823_v40  ;;  %v2885_v34 = vld [vmem:[%s3144_s18 + $0x208] sm:$0xff]   ;;  %v2891_v40 = vld [vmem:[%s3432_s1 + $0x20] ss:$80 sps:$4 sm:$0x7f]  }
  0x3e   : > { %2563 = vmatpush3.bf16.msra.mxu1 %v2824_v41  ;;  %1774 = vmatprep.mubr.bf16.mxu0 %v2855_v36  ;;  %v2887_v36 = vld [vmem:[%s3144_s18 + $0x240] sm:$0xff]   ;;  %v2897_v41 = vld [vmem:[%s3144_s18 + $0x378] sm:$0xff]  }
  0x3f   : > { %2542 = vmatprep.subr.bf16.mxu0 %v2825_v42  ;;  %1815 = vmatprep.mubr.bf16.mxu1 %v2858_v38  ;;  %v2889_v38 = vld [vmem:[%s3144_s18 + $0x200] sm:$0xff]  }
  0x40   : > { %2564 = vmatprep.subr.bf16.mxu1 %v2826_v43  ;;  %v2893_v42 = vld [vmem:[%s3432_s1 + $0x24] ss:$80 sps:$4 sm:$0x7f]   ;;  %v2898_v43 = vld [vmem:[%s3144_s18 + $0x3f8] sm:$0xff]  }
  0x41   : > { %2543 = vmatpush3.bf16.msra.mxu0 %v2827_v44  ;;  %v2894_v44 = vld [vmem:[%s3432_s1 + $0x28] ss:$80 sps:$4 sm:$0x7f]  }
  0x42   : > { %2565 = vmatpush3.bf16.msra.mxu1 %v2828_v45  ;;  %2544 = vmatprep.subr.bf16.mxu0 %v2829_v46  ;;  %v2896_v45 = vld [vmem:[%s3432_s1 + $0x2c] ss:$80 sps:$4 sm:$0x7f]  }
  0x43   : > { %2566 = vmatprep.subr.bf16.mxu1 %v2830_v47  ;;  %v2899_v46 = vld [vmem:[%s3144_s18 + $0x338] sm:$0xff]  }
  0x44   : > { %v2900_v47 = vld [vmem:[%s3144_s18 + $0x3b8] sm:$0xff]  }
  0x45   : > { %2545 = vmatpush3.bf16.msra.mxu0 %v2831_v48  ;;  %v2901_v48 = vld [vmem:[%s3144_s18 + $0x370] sm:$0xff]  }
  0x46   : > { %2567 = vmatpush3.bf16.msra.mxu1 %v2832_v49  ;;  %2546 = vmatprep.subr.bf16.mxu0 %v2833_v50  ;;  %v2902_v49 = vld [vmem:[%s3144_s18 + $0x3f0] sm:$0xff]  }
  0x47   : > { %2568 = vmatprep.subr.bf16.mxu1 %v2834_v51  ;;  %v2903_v50 = vld [vmem:[%s3144_s18 + $0x330] sm:$0xff]  }
  0x48   : > { %v2904_v51 = vld [vmem:[%s3144_s18 + $0x3b0] sm:$0xff]  }
  0x49   : > { %2547 = vmatpush3.bf16.msra.mxu0 %v2835_v52  ;;  %v2905_v52 = vld [vmem:[%s3144_s18 + $0x368] sm:$0xff]  }
  0x4a   : > { %2569 = vmatpush3.bf16.msra.mxu1 %v2836_v53  ;;  %2548 = vmatprep.subr.bf16.mxu0 %v2837_v54  ;;  %v2906_v53 = vld [vmem:[%s3144_s18 + $0x3e8] sm:$0xff]  }
  0x4b   : > { %2570 = vmatprep.subr.bf16.mxu1 %v2838_v55  ;;  %v2907_v54 = vld [vmem:[%s3144_s18 + $0x328] sm:$0xff]  }
  0x4c   : > { %v2908_v55 = vld [vmem:[%s3144_s18 + $0x3a8] sm:$0xff]  }
  0x4d   : > { %2549 = vmatpush3.bf16.msra.mxu0 %v2839_v56  ;;  %v2909_v56 = vld [vmem:[%s3144_s18 + $0x360] sm:$0xff]  }
  0x4e   : > { %2571 = vmatpush3.bf16.msra.mxu1 %v2840_v57  ;;  %2550 = vmatprep.subr.bf16.mxu0 %v2841_v58  ;;  %v2910_v57 = vld [vmem:[%s3144_s18 + $0x3e0] sm:$0xff]  }
  0x4f   : > { %2572 = vmatprep.subr.bf16.mxu1 %v2842_v59  ;;  %v2911_v58 = vld [vmem:[%s3144_s18 + $0x320] sm:$0xff]  }
  0x50   : > { %v2912_v59 = vld [vmem:[%s3144_s18 + $0x3a0] sm:$0xff]  }
  0x51   : > { %2551 = vmatpush3.bf16.msra.mxu0 %v2843_v60  ;;  %v2913_v60 = vld [vmem:[%s3144_s18 + $0x358] sm:$0xff]  }
  0x52   : > { %2573 = vmatpush3.bf16.msra.mxu1 %v2844_v61  ;;  %2552 = vmatprep.subr.bf16.mxu0 %v2845_v62  ;;  %v2914_v61 = vld [vmem:[%s3144_s18 + $0x3d8] sm:$0xff]  }
  0x53   : > { %2574 = vmatprep.subr.bf16.mxu1 %v2846_v63  ;;  %v2915_v62 = vld [vmem:[%s3144_s18 + $0x318] sm:$0xff]  }
  0x54   : > { %v2916_v63 = vld [vmem:[%s3144_s18 + $0x398] sm:$0xff]  }
  0x55   : > { %2553 = vmatpush3.bf16.msra.mxu0 %v2847_v0  ;;  %v2917_v0 = vld [vmem:[%s3144_s18 + $0x350] sm:$0xff]  }
  0x56   : > { %2575 = vmatpush3.bf16.msra.mxu1 %v2848_v1  ;;  %2554 = vmatprep.subr.bf16.mxu0 %v2849_v2  ;;  %v2918_v1 = vld [vmem:[%s3144_s18 + $0x3d0] sm:$0xff]  }
  0x57   : > { %2576 = vmatprep.subr.bf16.mxu1 %v2850_v3  ;;  %v2919_v2 = vld [vmem:[%s3144_s18 + $0x310] sm:$0xff]  }
  0x58   : > { %v2920_v3 = vld [vmem:[%s3144_s18 + $0x390] sm:$0xff]  }
  0x59   : > { %2555 = vmatpush3.bf16.msra.mxu0 %v2851_v5  ;;  %v2922_v5 = vld [vmem:[%s3144_s18 + $0x3c8] sm:$0xff]  }
  0x5a   : > { %2577 = vmatpush3.bf16.msra.mxu1 %v2852_v7  ;;  %2584 = vmatprep.subr.bf16.mxu0 %v2859_v8  ;;  %v2924_v7 = vld [vmem:[%s3144_s18 + $0x388] sm:$0xff]   ;;  %v2925_v8 = vld [vmem:[%s3144_s18 + $0x340] sm:$0xff]  }
  0x5b   : > { %2606 = vmatprep.subr.bf16.mxu1 %v2860_v9  ;;  %v2926_v9 = vld [vmem:[%s3144_s18 + $0x3c0] sm:$0xff]  }
  0x5c   : > { %1775 = vmatmul.mubr.bf16.vlgmr.msra.gmra.mxu0 %v2853_v4  ;;  %v2921_v4 = vld [vmem:[%s3144_s18 + $0x348] sm:$0xff]  }
  0x5d   : > { %1816 = vmatmul.mubr.bf16.vlgmr.msra.gmra.mxu1 %v2856_v6  ;;  %2585 = vmatpush3.bf16.msra.mxu0 %v2861_v10  ;;  %v2923_v6 = vld [vmem:[%s3144_s18 + $0x308] sm:$0xff]   ;;  %v2927_v10 = vld [vmem:[%s3144_s18 + $0x300] sm:$0xff]  }
  0x5e   : > { %2607 = vmatpush3.bf16.msra.mxu1 %v2862_v11  ;;  %2586 = vmatprep.subr.bf16.mxu0 %v2863_v12  ;;  %v2928_v11 = vld [vmem:[%s3144_s18 + $0x380] sm:$0xff]  }
  0x5f   : > { %2608 = vmatprep.subr.bf16.mxu1 %v2864_v13  ;;  %1856 = vmatprep.mubr.bf16.mxu0 %v2893_v42  ;;  %v2929_v12 = vld [vmem:[%s3432_s1 + $0x30] ss:$80 sps:$4 sm:$0x7f]   ;;  %v2931_v13 = vld [vmem:[%s3432_s1 + $0x34] ss:$80 sps:$4 sm:$0x7f]  }
  0x60   : > { %1897 = vmatprep.mubr.bf16.mxu1 %v2896_v45  ;;  %v2961_v42 = vld [vmem:[%s3144_s18 + $0x408] sm:$0xff]   ;;  %v2964_v45 = vld [vmem:[%s3144_s18 + $0x4c0] sm:$0xff]  }
  0x61   : > { %2587 = vmatpush3.bf16.msra.mxu0 %v2865_v14  ;;  %v2932_v14 = vld [vmem:[%s3432_s1 + $0x38] ss:$80 sps:$4 sm:$0x7f]  }
  0x62   : > { %2609 = vmatpush3.bf16.msra.mxu1 %v2866_v15  ;;  %2588 = vmatprep.subr.bf16.mxu0 %v2867_v16  ;;  %v2934_v15 = vld [vmem:[%s3432_s1 + $0x3c] ss:$80 sps:$4 sm:$0x7f]  }
  0x63   : > { %2610 = vmatprep.subr.bf16.mxu1 %v2868_v17  ;;  %v2935_v16 = vld [vmem:[%s3144_s18 + $0x478] sm:$0xff]  }
  0x64   : > { %v2936_v17 = vld [vmem:[%s3144_s18 + $0x4f8] sm:$0xff]  }
  0x65   : > { %2589 = vmatpush3.bf16.msra.mxu0 %v2869_v18  ;;  %v2937_v18 = vld [vmem:[%s3144_s18 + $0x438] sm:$0xff]  }
  0x66   : > { %2611 = vmatpush3.bf16.msra.mxu1 %v2870_v19  ;;  %2590 = vmatprep.subr.bf16.mxu0 %v2871_v20  ;;  %v2938_v19 = vld [vmem:[%s3144_s18 + $0x4b8] sm:$0xff]   ;;  %v2939_v20 = vld [vmem:[%s3144_s18 + $0x470] sm:$0xff]  }
  0x67   : > { %2612 = vmatprep.subr.bf16.mxu1 %v2872_v21  ;;  %v2940_v21 = vld [vmem:[%s3144_s18 + $0x4f0] sm:$0xff]  }
  0x69   : > { %2591 = vmatpush3.bf16.msra.mxu0 %v2873_v22  ;;  %v2941_v22 = vld [vmem:[%s3144_s18 + $0x430] sm:$0xff]  }
  0x6a   : > { %2613 = vmatpush3.bf16.msra.mxu1 %v2874_v23  ;;  %2592 = vmatprep.subr.bf16.mxu0 %v2875_v24  ;;  %v2942_v23 = vld [vmem:[%s3144_s18 + $0x4b0] sm:$0xff]   ;;  %v2943_v24 = vld [vmem:[%s3144_s18 + $0x468] sm:$0xff]  }
  0x6b   : > { %2614 = vmatprep.subr.bf16.mxu1 %v2876_v25  ;;  %v2944_v25 = vld [vmem:[%s3144_s18 + $0x4e8] sm:$0xff]  }
  0x6d   : > { %2593 = vmatpush3.bf16.msra.mxu0 %v2877_v26  ;;  %v2945_v26 = vld [vmem:[%s3144_s18 + $0x428] sm:$0xff]  }
  0x6e   : > { %2615 = vmatpush3.bf16.msra.mxu1 %v2878_v27  ;;  %2594 = vmatprep.subr.bf16.mxu0 %v2879_v28  ;;  %v2946_v27 = vld [vmem:[%s3144_s18 + $0x4a8] sm:$0xff]   ;;  %v2947_v28 = vld [vmem:[%s3144_s18 + $0x460] sm:$0xff]  }
  0x6f   : > { %2616 = vmatprep.subr.bf16.mxu1 %v2880_v29  ;;  %v2948_v29 = vld [vmem:[%s3144_s18 + $0x4e0] sm:$0xff]  }
  0x71   : > { %2595 = vmatpush3.bf16.msra.mxu0 %v2881_v30  ;;  %v2949_v30 = vld [vmem:[%s3144_s18 + $0x420] sm:$0xff]  }
  0x72   : > { %2617 = vmatpush3.bf16.msra.mxu1 %v2882_v31  ;;  %2596 = vmatprep.subr.bf16.mxu0 %v2883_v32  ;;  %v2950_v31 = vld [vmem:[%s3144_s18 + $0x4a0] sm:$0xff]   ;;  %v2951_v32 = vld [vmem:[%s3144_s18 + $0x458] sm:$0xff]  }
  0x73   : > { %2618 = vmatprep.subr.bf16.mxu1 %v2884_v33  ;;  %v2952_v33 = vld [vmem:[%s3144_s18 + $0x4d8] sm:$0xff]  }
  0x75   : > { %2597 = vmatpush3.bf16.msra.mxu0 %v2885_v34  ;;  %v2953_v34 = vld [vmem:[%s3144_s18 + $0x418] sm:$0xff]  }
  0x76   : > { %2619 = vmatpush3.bf16.msra.mxu1 %v2886_v35  ;;  %2598 = vmatprep.subr.bf16.mxu0 %v2887_v36  ;;  %v2954_v35 = vld [vmem:[%s3144_s18 + $0x498] sm:$0xff]   ;;  %v2955_v36 = vld [vmem:[%s3144_s18 + $0x450] sm:$0xff]  }
  0x77   : > { %2620 = vmatprep.subr.bf16.mxu1 %v2888_v37  ;;  %v2956_v37 = vld [vmem:[%s3144_s18 + $0x4d0] sm:$0xff]  }
  0x79   : > { %2599 = vmatpush3.bf16.msra.mxu0 %v2889_v38  ;;  %v2957_v38 = vld [vmem:[%s3144_s18 + $0x410] sm:$0xff]  }
  0x7a   : > { %2621 = vmatpush3.bf16.msra.mxu1 %v2890_v39  ;;  %2628 = vmatprep.subr.bf16.mxu0 %v2897_v41  ;;  %v2958_v39 = vld [vmem:[%s3144_s18 + $0x490] sm:$0xff]   ;;  %v2960_v41 = vld [vmem:[%s3144_s18 + $0x4c8] sm:$0xff]  }
  0x7b   : > { %2650 = vmatprep.subr.bf16.mxu1 %v2898_v43  ;;  %v2962_v43 = vld [vmem:[%s3144_s18 + $0x488] sm:$0xff]  }
  0x7c   : > { %1857 = vmatmul.mubr.bf16.vlgmr.msra.gmra.mxu0 %v2891_v40  ;;  %v2959_v40 = vld [vmem:[%s3144_s18 + $0x448] sm:$0xff]  }
  0x7d   : > { %1898 = vmatmul.mubr.bf16.vlgmr.msra.gmra.mxu1 %v2894_v44  ;;  %2629 = vmatpush3.bf16.msra.mxu0 %v2899_v46  ;;  %v2963_v44 = vld [vmem:[%s3144_s18 + $0x440] sm:$0xff]  }
  0x7e   : > { %2651 = vmatpush3.bf16.msra.mxu1 %v2900_v47  ;;  %2630 = vmatprep.subr.bf16.mxu0 %v2901_v48  ;;  %v2965_v46 = vld [vmem:[%s3144_s18 + $0x400] sm:$0xff]  }
  0x7f   : > { %2652 = vmatprep.subr.bf16.mxu1 %v2902_v49  ;;  %1938 = vmatprep.mubr.bf16.mxu0 %v2931_v13  ;;  %v2966_v47 = vld [vmem:[%s3144_s18 + $0x480] sm:$0xff]  }
  0x80   : > { %1979 = vmatprep.mubr.bf16.mxu1 %v2934_v15  ;;  %v2967_v48 = vld [vmem:[%s3432_s1 + $0x40] ss:$80 sps:$4 sm:$0x7f]   ;;  %v2969_v49 = vld [vmem:[%s3432_s1 + $0x44] ss:$80 sps:$4 sm:$0x7f]  }
  0x81   : > { %2631 = vmatpush3.bf16.msra.mxu0 %v2903_v50  ;;  %v2970_v50 = vld [vmem:[%s3432_s1 + $0x48] ss:$80 sps:$4 sm:$0x7f]  }
  0x82   : > { %2653 = vmatpush3.bf16.msra.mxu1 %v2904_v51  ;;  %2632 = vmatprep.subr.bf16.mxu0 %v2905_v52  ;;  %v2972_v51 = vld [vmem:[%s3432_s1 + $0x4c] ss:$80 sps:$4 sm:$0x7f]  }
  0x83   : > { %2654 = vmatprep.subr.bf16.mxu1 %v2906_v53  ;;  %v2973_v52 = vld [vmem:[%s3434_s3 + $0x18] sm:$0xff]   ;;  %v3041_v53 = vmov 0.0  }
  0x85   : > { %2633 = vmatpush3.bf16.msra.mxu0 %v2907_v54  ;;  %v2974_v54 = vld [vmem:[%s3434_s3 + $0x10] sm:$0xff]  }
  0x86   : > { %2655 = vmatpush3.bf16.msra.mxu1 %v2908_v55  ;;  %2634 = vmatprep.subr.bf16.mxu0 %v2909_v56  ;;  %v2975_v55 = vld [vmem:[%s3434_s3 + $0x8] sm:$0xff]   ;;  %v2976_v56 = vld [vmem:[%s3434_s3] sm:$0xff]  }
  0x87   : > { %2656 = vmatprep.subr.bf16.mxu1 %v2910_v57 }
  0x89   : > { %2635 = vmatpush3.bf16.msra.mxu0 %v2911_v58 }
  0x8a   : > { %2657 = vmatpush3.bf16.msra.mxu1 %v2912_v59  ;;  %2636 = vmatprep.subr.bf16.mxu0 %v2913_v60 }
  0x8b   : > { %2658 = vmatprep.subr.bf16.mxu1 %v2914_v61 }
  0x8d   : > { %2637 = vmatpush3.bf16.msra.mxu0 %v2915_v62 }
  0x8e   : > { %2659 = vmatpush3.bf16.msra.mxu1 %v2916_v63  ;;  %2638 = vmatprep.subr.bf16.mxu0 %v2917_v0 }
  0x8f   : > { %2660 = vmatprep.subr.bf16.mxu1 %v2918_v1 }
  0x91   : > { %2639 = vmatpush3.bf16.msra.mxu0 %v2919_v2 }
  0x92   : > { %2661 = vmatpush3.bf16.msra.mxu1 %v2920_v3  ;;  %2640 = vmatprep.subr.bf16.mxu0 %v2921_v4 }
  0x93   : > { %2662 = vmatprep.subr.bf16.mxu1 %v2922_v5 }
  0x95   : > { %2641 = vmatpush3.bf16.msra.mxu0 %v2923_v6 }
  0x96   : > { %2663 = vmatpush3.bf16.msra.mxu1 %v2924_v7  ;;  %2642 = vmatprep.subr.bf16.mxu0 %v2925_v8 }
  0x97   : > { %2664 = vmatprep.subr.bf16.mxu1 %v2926_v9 }
  0x99   : > { %2643 = vmatpush3.bf16.msra.mxu0 %v2927_v10 }
  0x9a   : > { %2665 = vmatpush3.bf16.msra.mxu1 %v2928_v11  ;;  %2672 = vmatprep.subr.bf16.mxu0 %v2935_v16 }
  0x9b   : > { %2694 = vmatprep.subr.bf16.mxu1 %v2936_v17 }
  0x9c   : > { %1939 = vmatmul.mubr.bf16.vlgmr.msra.gmra.mxu0 %v2929_v12 }
  0x9d   : > { %1980 = vmatmul.mubr.bf16.vlgmr.msra.gmra.mxu1 %v2932_v14  ;;  %2673 = vmatpush3.bf16.msra.mxu0 %v2937_v18 }
  0x9e   : > { %2695 = vmatpush3.bf16.msra.mxu1 %v2938_v19  ;;  %2674 = vmatprep.subr.bf16.mxu0 %v2939_v20 }
  0x9f   : > { %2696 = vmatprep.subr.bf16.mxu1 %v2940_v21  ;;  %2020 = vmatprep.mubr.bf16.mxu0 %v2969_v49 }
  0xa0   : > { %2061 = vmatprep.mubr.bf16.mxu1 %v2972_v51 }
  0xa1   : > { %2675 = vmatpush3.bf16.msra.mxu0 %v2941_v22 }
  0xa2   : > { %2697 = vmatpush3.bf16.msra.mxu1 %v2942_v23  ;;  %2676 = vmatprep.subr.bf16.mxu0 %v2943_v24 }
  0xa3   : > { %2698 = vmatprep.subr.bf16.mxu1 %v2944_v25 }
  0xa5   : > { %2677 = vmatpush3.bf16.msra.mxu0 %v2945_v26 }
  0xa6   : > { %2699 = vmatpush3.bf16.msra.mxu1 %v2946_v27  ;;  %2678 = vmatprep.subr.bf16.mxu0 %v2947_v28 }
  0xa7   : > { %2700 = vmatprep.subr.bf16.mxu1 %v2948_v29 }
  0xa9   : > { %2679 = vmatpush3.bf16.msra.mxu0 %v2949_v30 }
  0xaa   : > { %2701 = vmatpush3.bf16.msra.mxu1 %v2950_v31  ;;  %2680 = vmatprep.subr.bf16.mxu0 %v2951_v32 }
  0xab   : > { %2702 = vmatprep.subr.bf16.mxu1 %v2952_v33 }
  0xad   : > { %2681 = vmatpush3.bf16.msra.mxu0 %v2953_v34 }
  0xae   : > { %2703 = vmatpush3.bf16.msra.mxu1 %v2954_v35  ;;  %2682 = vmatprep.subr.bf16.mxu0 %v2955_v36 }
  0xaf   : > { %2704 = vmatprep.subr.bf16.mxu1 %v2956_v37 }
  0xb1   : > { %2683 = vmatpush3.bf16.msra.mxu0 %v2957_v38 }
  0xb2   : > { %2705 = vmatpush3.bf16.msra.mxu1 %v2958_v39  ;;  %2684 = vmatprep.subr.bf16.mxu0 %v2959_v40 }
  0xb3   : > { %2706 = vmatprep.subr.bf16.mxu1 %v2960_v41 }
  0xb5   : > { %2685 = vmatpush3.bf16.msra.mxu0 %v2961_v42 }
  0xb6   : > { %2707 = vmatpush3.bf16.msra.mxu1 %v2962_v43  ;;  %2686 = vmatprep.subr.bf16.mxu0 %v2963_v44 }
  0xb7   : > { %2708 = vmatprep.subr.bf16.mxu1 %v2964_v45 }
  0xb9   : > { %2687 = vmatpush3.bf16.msra.mxu0 %v2965_v46 }
  0xba   : > { %2709 = vmatpush3.bf16.msra.mxu1 %v2966_v47  ;;  %2723 = vmatprep.subr.bf16.mxu0 %v3041_v53 }
  0xbb   : > { %2735 = vmatprep.subr.bf16.mxu1 %v3041_v53 }
  0xbc   : > { %2021 = vmatmul.mubr.bf16.vlgmr.msra.gmra.mxu0 %v2967_v48 }
  0xbd   : > { %2062 = vmatmul.mubr.bf16.vlgmr.msra.gmra.mxu1 %v2970_v50  ;;  %2724 = vmatpush3.bf16.msra.mxu0 %v2973_v52 }
  0xbe   : > { %2725 = vmatprep.subr.bf16.mxu0 %v3041_v53  ;;  %2731 = vmatprep.mubr.msk.bf16.mxu0 %vm3042_vm0, %v3041_v53 }
  0xbf   : > { %2737 = vmatprep.mubr.msk.bf16.mxu1 %vm3042_vm0, %v3041_v53 }
  0xc1   : > { %2726 = vmatpush3.bf16.msra.mxu0 %v2974_v54 }
  0xc2   : > { %2727 = vmatprep.subr.bf16.mxu0 %v3041_v53 }
  0xc5   : > { %2728 = vmatpush3.bf16.msra.mxu0 %v2975_v55 }
  0xc6   : > { %2729 = vmatprep.subr.bf16.mxu0 %v3041_v53 }
  0xc9   : > { %2730 = vmatpush3.bf16.msra.mxu0 %v2976_v56 }
  0xfc   : > { %v2512_v57 = vpop.f32.mrf.mxu0 }
  0xfd   : > { %v2534_v58 = vpop.f32.mrf.mxu1 }
  0xfe   : > { %v2513_v59 = vpop.f32.mrf.mxu0 }
  0xff   : > { %v2535_v60 = vpop.f32.mrf.mxu1  ;;  %v2514_v14 = vadd.f32 %v2513_v59, %v2512_v57 }
 0x100   : > { %v2515_v61 = vpop.f32.mrf.mxu0  ;;  %v2536_v15 = vadd.f32 %v2535_v60, %v2534_v58 }
 0x101   : > { %v2537_v62 = vpop.f32.mrf.mxu1 }
 0x102   : > { %v2516_v63 = vpop.f32.mrf.mxu0  ;;  %v1736_v20 = vadd.f32 %v2536_v15, %v2514_v14  ;;  %v2152_v14 = vld [vmem:[%s3435_s4] sm:$0x1]  ;;  %v2080_v15 = vstv %s2079_s22 }
 0x103   : > { %v2538_v1 = vpop.f32.mrf.mxu1  ;;  %v2517_v21 = vadd.f32 %v2516_v63, %v2515_v61 }
 0x104   : > { %v2539_v22 = vadd.f32 %v2538_v1, %v2537_v62 }
 0x106   : > { %v1739_v29 = vadd.f32 %v2539_v22, %v2517_v21 }
 0x11c   : > { %v2556_v0 = vpop.f32.mrf.mxu0 }
 0x11d   : > { %v2578_v2 = vpop.f32.mrf.mxu1 }
 0x11e   : > { %v2557_v3 = vpop.f32.mrf.mxu0 }
 0x11f   : > { %v2579_v4 = vpop.f32.mrf.mxu1  ;;  %v2558_v18 = vadd.f32 %v2557_v3, %v2556_v0 }
 0x120   : > { %v2559_v5 = vpop.f32.mrf.mxu0  ;;  %v2580_v25 = vadd.f32 %v2579_v4, %v2578_v2 }
 0x121   : > { %v2581_v6 = vpop.f32.mrf.mxu1  ;;  %v1777_v24 = vadd.f32 %v2558_v18, %v1736_v20 }
 0x122   : > { %v2560_v7 = vpop.f32.mrf.mxu0 }
 0x123   : > { %v2582_v9 = vpop.f32.mrf.mxu1  ;;  %v2561_v26 = vadd.f32 %v2560_v7, %v2559_v5  ;;  %v1818_v31 = vadd.f32 %v2580_v25, %v1777_v24 }
 0x124   : > { %v2583_v35 = vadd.f32 %v2582_v9, %v2581_v6 }
 0x125   : > { %v1780_v32 = vadd.f32 %v2561_v26, %v1739_v29 }
 0x127   : > { %v1821_v39 = vadd.f32 %v2583_v35, %v1780_v32 }
 0x13c   : > { %v2600_v8 = vpop.f32.mrf.mxu0 }
 0x13d   : > { %v2622_v10 = vpop.f32.mrf.mxu1 }
 0x13e   : > { %v2601_v11 = vpop.f32.mrf.mxu0 }
 0x13f   : > { %v2623_v12 = vpop.f32.mrf.mxu1  ;;  %v2602_v30 = vadd.f32 %v2601_v11, %v2600_v8 }
 0x140   : > { %v2603_v13 = vpop.f32.mrf.mxu0  ;;  %v2624_v37 = vadd.f32 %v2623_v12, %v2622_v10 }
 0x141   : > { %v2625_v16 = vpop.f32.mrf.mxu1  ;;  %v1859_v36 = vadd.f32 %v2602_v30, %v1818_v31 }
 0x142   : > { %v2604_v17 = vpop.f32.mrf.mxu0 }
 0x143   : > { %v2626_v23 = vpop.f32.mrf.mxu1  ;;  %v2605_v38 = vadd.f32 %v2604_v17, %v2603_v13  ;;  %v1900_v43 = vadd.f32 %v2624_v37, %v1859_v36 }
 0x144   : > { %v2627_v45 = vadd.f32 %v2626_v23, %v2625_v16 }
 0x145   : > { %v1862_v44 = vadd.f32 %v2605_v38, %v1821_v39 }
 0x147   : > { %v1903_v51 = vadd.f32 %v2627_v45, %v1862_v44 }
 0x15c   : > { %v2644_v19 = vpop.f32.mrf.mxu0 }
 0x15d   : > { %v2666_v27 = vpop.f32.mrf.mxu1 }
 0x15e   : > { %v2645_v28 = vpop.f32.mrf.mxu0 }
 0x15f   : > { %v2667_v33 = vpop.f32.mrf.mxu1  ;;  %v2646_v40 = vadd.f32 %v2645_v28, %v2644_v19 }
 0x160   : > { %v2647_v34 = vpop.f32.mrf.mxu0  ;;  %v2668_v47 = vadd.f32 %v2667_v33, %v2666_v27 }
 0x161   : > { %v2669_v41 = vpop.f32.mrf.mxu1  ;;  %v1941_v46 = vadd.f32 %v2646_v40, %v1900_v43 }
 0x162   : > { %v2648_v42 = vpop.f32.mrf.mxu0 }
 0x163   : > { %v2649_v48 = vadd.f32 %v2648_v42, %v2647_v34  ;;  %v2670_v49 = vpop.f32.mrf.mxu1  ;;  %v1982_v54 = vadd.f32 %v2668_v47, %v1941_v46 }
 0x164   : > { %v2671_v59 = vadd.f32 %v2670_v49, %v2669_v41 }
 0x165   : > { %v1944_v55 = vadd.f32 %v2649_v48, %v1903_v51 }
 0x167   : > { %v1985_v0 = vadd.f32 %v2671_v59, %v1944_v55 }
 0x17c   : > { %v2688_v50 = vpop.f32.mrf.mxu0 }
 0x17d   : > { %v2710_v52 = vpop.f32.mrf.mxu1 }
 0x17e   : > { %v2689_v53 = vpop.f32.mrf.mxu0 }
 0x17f   : > { %v2690_v56 = vadd.f32 %v2689_v53, %v2688_v50  ;;  %v2711_v57 = vpop.f32.mrf.mxu1 }
 0x180   : > { %v2691_v58 = vpop.f32.mrf.mxu0  ;;  %v2712_v61 = vadd.f32 %v2711_v57, %v2710_v52 }
 0x181   : > { %v2023_v60 = vadd.f32 %v2690_v56, %v1982_v54  ;;  %v2713_v62 = vpop.f32.mrf.mxu1 }
 0x182   : > { %v2692_v63 = vpop.f32.mrf.mxu0 }
 0x183   : > { %v2064_v1 = vadd.f32 %v2712_v61, %v2023_v60  ;;  %v2693_v2 = vadd.f32 %v2692_v63, %v2691_v58  ;;  %v2714_v3 = vpop.f32.mrf.mxu1 }
 0x184   : > { %v2715_v6 = vadd.f32 %v2714_v3, %v2713_v62 }
 0x185   : > { %v2070_v4 = vpack.c.bf16 %v2064_v1, %v2064_v1  ;;  %v2026_v5 = vadd.f32 %v2693_v2, %v1985_v0 }
 0x187   : > { %v2067_v7 = vadd.f32 %v2715_v6, %v2026_v5  ;;  %2732 = vmatmul.mubr.msk.bf16.vlgmr.msra.gmra.mxu0 %vm2105_vm1, %v2070_v4 }
 0x189   : > { %v2153_v8 = vpack.c.bf16 %v2067_v7, %v2064_v1 }
 0x18b   : > { %v2157_v9 = vshll.u32 %v2153_v8, 16  ;;  %v2155_v10 = vshrl.u32 %v2153_v8, 16 }
 0x18d   : > { %v2159_v11 = vrot.slane %v2157_v9, 1 }
 0x18f   : > { %v2160_v12 = vor.u32 %v2159_v11, %v2155_v10 }
 0x191   : > { %v2165_v13 = vsel %vm2105_vm1, %v2160_v12, 0 }
 0x192   : > { %2736 = vmatpush3.bf16.xpose.msra.mxu1 %v2165_v13 }
 0x199   : > { %2738 = vmatmul.mubr.msk.bf16.vlgmr.msra.gmra.mxu1 %vm2105_vm1, %v2152_v14 }
 0x247   : > { %v2143_v16 = vpop.f32.mrf.mxu0 }
 0x248   : > { %v2144_v17 = vadd.f32 %v2143_v16, %v2080_v15 }
 0x249   : > { %v2733_v18 = vpop.f32.mrf.mxu0 }
 0x24a   : > { %2977 = vtanh.f32 %v2144_v17 }
 0x24b   : > { %v2146_v19 = vpop.f32.mrf.mxu0 }
 0x24d   : > { %v2734_v20 = vpop.f32.mrf.mxu0 }
 0x257   : > { %v2978_v21 = vpop.eup %2977 }
 0x258   : > { %2151 = vst.msk [vmem:[%s250_s30] sm:$0x1] %vm2150_vm2, %v2978_v21 }
 0x259   : > { %v2201_v22 = vpop.f32.mrf.mxu1 }
 0x25a   : > { %2992 = shalt.err (!%p2989_p3)
}
 0x25b   : > { %s2993_s22 = scalar_lea.hbm %s3380_s13, 16  ;;  %s2997_s30 = scalar_lea.hbm %s3437_s6, 32 }
 0x25c   : > { %p2994_p4 = scmp.ne.s32.totalorder %s3380_s13, %s2993_s22  ;;  %p2998_p9 = scmp.lt.s32.totalorder %s3380_s13, %s3437_s6 }
 0x25d   : > { %p2999_p10 = scmp.lt.s32.totalorder %s2997_s30, %s2993_s22 }
 0x25e   : > { %p2995_p7 = pnand %p2994_p4, %p3120_p5 }
 0x25f   : > { %p3000_p11 = por %p2999_p10, %p2998_p9 }
 0x260   : > { %p2996_p8 = pneg %p2995_p7 }
 0x262   : > { %p3001_p12 = pnand %p3000_p11, %p2996_p8 }
 0x264   : > { %3004 = shalt.err (!%p3001_p12)
}
 0x265   : > { %2742 = dma.vmem_to_hbm [thread:$0]  (%p3120_p5), %s3382_s10, 16, %s3380_s13, %s2213_s2   ;;  %2208 = vst.msk [vmem:[%s258_s16] sm:$0x1] %vm2207_vm3, %v2201_v22  ;;  %v2739_v23 = vpop.f32.mrf.mxu1 }
 0x267   : > { %v2204_v24 = vpop.f32.mrf.mxu1 }
 0x269   : > { %v2740_v25 = vpop.f32.mrf.mxu1 }
 0x26a PF: > { %p2748_p13 = scmp.ge.s32.totalorder %s3039_s26, 2  ;;  %s2246_s17 = sand.u32 1, %s3027_s23  }
 0x26b   : > { %s2247_s8 = scalar_lea.sflag [#allocation4], %s2246_s17 }
 0x26c   : > { %p2745_p0 = pnand %p2748_p13, %p3124_p6 }
 0x26e   : > { %p2746_p1 = pneg %p2745_p0 }
 0x270   : > { %3022 = dma.done.wait (%p2746_p1), %s2247_s8, 16  }
 0x271   : > { %3024 = vsyncadd (%p2746_p1), %s2247_s8, 4294967280  ;;  %p18_p5 = scmp.ge.s32.totalorder %s3107_s28, 4   ;;  %s3440_s23 = smov %s3031_s24 }
 0x272   : > { %s3441_s24 = smov %s3035_s25  ;;  %s3442_s25 = smov %s3118_s7 }
 0x273   : > { %s3443_s26 = smov %s3107_s28  ;;  %20 = sbr.rel (!%p18_p5) target bundleno = 5 (0x5), region = 87 }
 0x278   :  { %2251 = vsyncpa [#allocation4], 1 }
 0x279   :  { %2253 = vsyncpa [#allocation4 + $0x1], 1 }

</bundles_post_ra>
